<compile_context>
chip_gen: v7x
topology: tpu7x:2x2x1
jax: 0.10.0
libtpu: 0.0.40
codegen_flags: <defaults>
</compile_context>

<pallas_src>
import functools
import math

import jax
import jax.numpy as jnp
from jax.experimental import pallas as pl
from jax.experimental.pallas import tpu as pltpu


def _round_up(x, m):
    return (x + m - 1) // m * m


def _gelu_tanh(x):
    # tanh goes to the EUP slot — essentially free next to the two MXU matmuls.
    c = jnp.float32(0.7978845608028654)  # sqrt(2/pi)
    return 0.5 * x * (1.0 + jnp.tanh(c * (x + 0.044715 * x * x * x)))


def _connector_kernel(x_ref, w1_ref, b1_ref, w2_ref, b2_ref, o_ref):
    # x_ref:  (TILE_T, Din_p)  bf16   (row tile of tokens, pipelined)
    # w1_ref: (Din_p, H_p)     bf16   (VMEM-resident, single-buffered)
    # b1_ref: (1, H_p)         f32
    # w2_ref: (H_p, Dout_p)    bf16   (VMEM-resident, single-buffered)
    # b2_ref: (1, Dout_p)      f32
    # o_ref:  (TILE_T, Dout_p)        (lane-dense: Dout_p % 128 == 0)
    h = jnp.dot(x_ref[...], w1_ref[...], preferred_element_type=jnp.float32)
    h = h + b1_ref[...]            # broadcast over rows, f32
    h = _gelu_tanh(h)              # f32 VPU/EUP work, hidden under MXU time
    # TODO(synk): if vld/vst slots saturate on v7x, chunk H in ~512-col slices
    #             between the two dots instead of materializing full f32 h.
    y = jnp.dot(h.astype(jnp.bfloat16), w2_ref[...],
                preferred_element_type=jnp.float32)
    y = y + b2_ref[...]
    o_ref[...] = y.astype(o_ref.dtype)


def _plan_row_tiling(n_rows, max_tile):
    """Pick (tile, n_tiles, padded_rows) with tile % 8 == 0 and, when the
    problem has more than one sublane-row of tiles, an EVEN tile count so the
    "parallel" grid axis fills both TensorCores on v7x."""
    rows8 = _round_up(max(n_rows, 8), 8)
    max_tile = max(8, _round_up(min(max_tile, rows8), 8))
    n_tiles = pl.cdiv(rows8, max_tile)
    if n_tiles % 2 == 1 and rows8 > 8:
        n_tiles += 1
    tile = _round_up(pl.cdiv(rows8, n_tiles), 8)
    padded = tile * n_tiles
    return tile, n_tiles, padded


def _vmem_limit_bytes(tile_t, din_p, h_p, dout_p, out_itemsize, single_buffer):
    """Derive the scoped-VMEM request from the actual block footprint, capped
    below the chip's physical VMEM (64 MiB fallback keeps v7x safe)."""
    wbuf = 1 if single_buffer else 2
    weights = wbuf * 2 * (din_p * h_p + h_p * dout_p)       # bf16 weights
    biases = wbuf * 4 * (h_p + dout_p)                      # f32 biases
    x_tiles = 2 * tile_t * din_p * 2                        # bf16, double-buffered
    o_tiles = 2 * tile_t * dout_p * out_itemsize            # double-buffered
    h_scratch = tile_t * h_p * (4 + 2)                      # f32 h + bf16 recast
    need = weights + biases + x_tiles + o_tiles + h_scratch
    limit = int(need * 1.3) + (4 << 20)
    try:
        cap = int(getattr(pltpu.get_tpu_info(), "vmem_capacity_bytes", 64 << 20))
    except Exception:  # pragma: no cover - conservative fallback
        cap = 64 << 20
    return max(32 << 20, min(limit, cap - (8 << 20), 100 << 20))


def prepare_connector_params(w1, b1, w2, b2):
    """One-time (model-load) cast + pad of the connector weights.

    Feature dims are padded to multiples of 128 (lane-dense / full MXU
    columns); weights are cast to bf16 once so the per-forward path never
    re-reads the f32 masters. Zero padding is exact through both matmuls
    (gelu(0) == 0)."""
    din, h = w1.shape
    dout = w2.shape[1]
    din_p, h_p, dout_p = (_round_up(din, 128), _round_up(h, 128),
                          _round_up(dout, 128))
    w1p = jnp.pad(jnp.asarray(w1, jnp.bfloat16), ((0, din_p - din), (0, h_p - h)))
    w2p = jnp.pad(jnp.asarray(w2, jnp.bfloat16), ((0, h_p - h), (0, dout_p - dout)))
    b1p = jnp.pad(jnp.asarray(b1, jnp.float32), (0, h_p - h)).reshape(1, h_p)
    b2p = jnp.pad(jnp.asarray(b2, jnp.float32), (0, dout_p - dout)).reshape(1, dout_p)
    return (w1p, b1p, w2p, b2p, int(dout))


@functools.partial(
    jax.jit, static_argnames=("out_dim", "tile_t", "out_dtype", "single_buffer"))
def _forward_impl(x, w1p, b1p, w2p, b2p, *, out_dim, tile_t, out_dtype,
                  single_buffer):
    *lead, din = x.shape
    din_p, h_p = w1p.shape
    dout_p = w2p.shape[1]
    T = math.prod(lead) if lead else 1

    tile, n_tiles, T_p = _plan_row_tiling(T, tile_t)
    out_dtype = jnp.dtype(out_dtype) if out_dtype is not None else x.dtype

    # Per-call activation prep only (weights were prepared at load time).
    x2d = x.reshape(T, din).astype(jnp.bfloat16)
    x_pad = jnp.pad(x2d, ((0, T_p - T), (0, din_p - din)))

    weight_kwargs = (
        dict(pipeline_mode=pl.Buffered(buffer_count=1)) if single_buffer else {})

    flops = 2 * T_p * (din_p * h_p + h_p * dout_p)
    bytes_accessed = (T_p * din_p * 2 + (din_p * h_p + h_p * dout_p) * 2
                      + (h_p + dout_p) * 4 + T_p * dout_p * out_dtype.itemsize)

    out_pad = pl.pallas_call(
        _connector_kernel,
        out_shape=jax.ShapeDtypeStruct((T_p, dout_p), out_dtype),
        grid_spec=pl.GridSpec(
            grid=(n_tiles,),
            in_specs=[
                pl.BlockSpec((tile, din_p), lambda i: (i, 0)),              # x tile
                pl.BlockSpec((din_p, h_p), lambda i: (0, 0), **weight_kwargs),
                pl.BlockSpec((1, h_p), lambda i: (0, 0), **weight_kwargs),
                pl.BlockSpec((h_p, dout_p), lambda i: (0, 0), **weight_kwargs),
                pl.BlockSpec((1, dout_p), lambda i: (0, 0), **weight_kwargs),
            ],
            out_specs=pl.BlockSpec((tile, dout_p), lambda i: (i, 0)),
        ),
        compiler_params=pltpu.CompilerParams(
            dimension_semantics=("parallel",),
            vmem_limit_bytes=_vmem_limit_bytes(
                tile, din_p, h_p, dout_p, out_dtype.itemsize, single_buffer),
        ),
        cost_estimate=pl.CostEstimate(
            flops=flops,
            transcendentals=T_p * h_p,
            bytes_accessed=bytes_accessed,
        ),
    )(x_pad, w1p, b1p, w2p, b2p)

    out = out_pad[:T, :out_dim]
    return out.reshape(*lead, out_dim)


_PIPELINE_MODE_OK = {"single_buffer_weights": True}


def text_vision_connector_forward(x, params, *, tile_t=512, out_dtype=None):
    """x: (..., Din) -> (..., Dout). `params` from prepare_connector_params().

    Pass out_dtype=jnp.bfloat16 if the downstream consumer is bf16 to halve
    the output HBM stream (f32 accumulation is kept either way)."""
    w1p, b1p, w2p, b2p, out_dim = params
    if _PIPELINE_MODE_OK["single_buffer_weights"]:
        try:
            return _forward_impl(x, w1p, b1p, w2p, b2p, out_dim=out_dim,
                                 tile_t=tile_t, out_dtype=out_dtype,
                                 single_buffer=True)
        except Exception:
            # pl.Buffered(1) not supported by this jax/libtpu combination —
            # fall back to default (double-buffered) weight specs.
            _PIPELINE_MODE_OK["single_buffer_weights"] = False
    return _forward_impl(x, w1p, b1p, w2p, b2p, out_dim=out_dim,
                         tile_t=tile_t, out_dtype=out_dtype,
                         single_buffer=False)


def _reference_forward(x, w1, b1, w2, b2):
    # True PyTorch numerics: f32 end-to-end, exact (erf) GELU. The kernel's
    # bf16 operands + tanh-GELU deviation is validated against this with an
    # explicit tolerance rather than mirrored into the reference.
    xf = x.astype(jnp.float32)
    h = jnp.einsum("...d,dh->...h", xf, w1.astype(jnp.float32)) + b1.astype(jnp.float32)
    h = jax.nn.gelu(h, approximate=False)
    y = jnp.einsum("...h,ho->...o", h, w2.astype(jnp.float32)) + b2.astype(jnp.float32)
    return y.astype(x.dtype)


if __name__ == "__main__":
    # Small shapes: batch=2, seq=8, text hidden=32 -> mlp hidden=64 -> out=32.
    B, S, Din, H, Dout = 2, 8, 32, 64, 32

    key = jax.random.PRNGKey(0)
    kx, k1, k2, k3, k4 = jax.random.split(key, 5)

    x = jax.random.normal(kx, (B, S, Din), dtype=jnp.float32)
    w1 = jax.random.normal(k1, (Din, H), dtype=jnp.float32) * 0.02
    b1 = jax.random.normal(k2, (H,), dtype=jnp.float32) * 0.01
    w2 = jax.random.normal(k3, (H, Dout), dtype=jnp.float32) * 0.02
    b2 = jax.random.normal(k4, (Dout,), dtype=jnp.float32) * 0.01

    # One-time weight prep (model-load time), then the fused Pallas forward.
    params = prepare_connector_params(w1, b1, w2, b2)
    out = text_vision_connector_forward(x, params)
    out = jax.block_until_ready(out)

    ref = _reference_forward(x, w1, b1, w2, b2)
    assert out.shape == (B, S, Dout), out.shape
    assert jnp.allclose(out, ref, atol=5e-3, rtol=5e-2), "mismatch vs reference"

    print("KERNEL_OK")
</pallas_src>

<mosaic_0001>
module attributes {stable_mosaic.version = 11 : i64} {
  func.func @_connector_kernel(%arg0: i32, %arg1: memref<8x128xbf16, #tpu.memory_space<vmem>>, %arg2: memref<128x128xbf16, #tpu.memory_space<vmem>>, %arg3: memref<1x128xf32, #tpu.memory_space<vmem>>, %arg4: memref<128x128xbf16, #tpu.memory_space<vmem>>, %arg5: memref<1x128xf32, #tpu.memory_space<vmem>>, %arg6: memref<8x128xf32, #tpu.memory_space<vmem>>) attributes {dimension_semantics = [#tpu.dimension_semantics<parallel>], iteration_bounds = array<i64: 2>, scalar_prefetch = 0 : i64, scratch_operands = 0 : i64, tpu.core_type = #tpu.core_type<tc>, window_params = [{transform_indices = @transform_0, window_bounds = array<i64: 8, 128>}, {pipeline_mode = #tpu.pipeline_mode<synchronous>, transform_indices = @transform_1, window_bounds = array<i64: 128, 128>}, {pipeline_mode = #tpu.pipeline_mode<synchronous>, transform_indices = @transform_2, window_bounds = array<i64: 1, 128>}, {pipeline_mode = #tpu.pipeline_mode<synchronous>, transform_indices = @transform_3, window_bounds = array<i64: 128, 128>}, {pipeline_mode = #tpu.pipeline_mode<synchronous>, transform_indices = @transform_4, window_bounds = array<i64: 1, 128>}, {transform_indices = @transform_5, window_bounds = array<i64: 8, 128>}]} {
    %c0 = arith.constant 0 : index
    %c0_0 = arith.constant 0 : index
    %0 = vector.load %arg1[%c0, %c0_0] : memref<8x128xbf16, #tpu.memory_space<vmem>>, vector<8x128xbf16>
    %c0_1 = arith.constant 0 : index
    %c0_2 = arith.constant 0 : index
    %1 = vector.load %arg2[%c0_1, %c0_2] : memref<128x128xbf16, #tpu.memory_space<vmem>>, vector<128x128xbf16>
    %cst = arith.constant dense<0.000000e+00> : vector<8x128xf32>
    %2 = tpu.matmul %0, %1, %cst {dimension_numbers = #tpu.dot_dimension_numbers<[1], [0], [0], [1], [0, 0, 1, 1], [], []>} : vector<8x128xbf16>, vector<128x128xbf16>, vector<8x128xf32> -> vector<8x128xf32>
    %c0_3 = arith.constant 0 : index
    %c0_4 = arith.constant 0 : index
    %3 = vector.load %arg3[%c0_3, %c0_4] : memref<1x128xf32, #tpu.memory_space<vmem>>, vector<1x128xf32>
    %4 = vector.broadcast %3 : vector<1x128xf32> to vector<8x128xf32>
    %5 = arith.addf %2, %4 : vector<8x128xf32>
    %cst_5 = arith.constant 5.000000e-01 : f32
    %6 = vector.broadcast %cst_5 : f32 to vector<8x128xf32>
    %7 = arith.mulf %6, %5 : vector<8x128xf32>
    %cst_6 = arith.constant 4.471500e-02 : f32
    %8 = vector.broadcast %cst_6 : f32 to vector<8x128xf32>
    %9 = arith.mulf %8, %5 : vector<8x128xf32>
    %10 = arith.mulf %9, %5 : vector<8x128xf32>
    %11 = arith.mulf %10, %5 : vector<8x128xf32>
    %12 = arith.addf %5, %11 : vector<8x128xf32>
    %cst_7 = arith.constant 0.797884583 : f32
    %13 = vector.broadcast %cst_7 : f32 to vector<8x128xf32>
    %14 = arith.mulf %13, %12 : vector<8x128xf32>
    %15 = math.tanh %14 : vector<8x128xf32>
    %cst_8 = arith.constant 1.000000e+00 : f32
    %16 = vector.broadcast %cst_8 : f32 to vector<8x128xf32>
    %17 = arith.addf %16, %15 : vector<8x128xf32>
    %18 = arith.mulf %7, %17 : vector<8x128xf32>
    %19 = arith.truncf %18 : vector<8x128xf32> to vector<8x128xbf16>
    %c0_9 = arith.constant 0 : index
    %c0_10 = arith.constant 0 : index
    %20 = vector.load %arg4[%c0_9, %c0_10] : memref<128x128xbf16, #tpu.memory_space<vmem>>, vector<128x128xbf16>
    %cst_11 = arith.constant dense<0.000000e+00> : vector<8x128xf32>
    %21 = tpu.matmul %19, %20, %cst_11 {dimension_numbers = #tpu.dot_dimension_numbers<[1], [0], [0], [1], [0, 0, 1, 1], [], []>} : vector<8x128xbf16>, vector<128x128xbf16>, vector<8x128xf32> -> vector<8x128xf32>
    %c0_12 = arith.constant 0 : index
    %c0_13 = arith.constant 0 : index
    %22 = vector.load %arg5[%c0_12, %c0_13] : memref<1x128xf32, #tpu.memory_space<vmem>>, vector<1x128xf32>
    %23 = vector.broadcast %22 : vector<1x128xf32> to vector<8x128xf32>
    %24 = arith.addf %21, %23 : vector<8x128xf32>
    %c0_14 = arith.constant 0 : index
    %c0_15 = arith.constant 0 : index
    %25 = vector.load %arg6[%c0_14, %c0_15] : memref<8x128xf32, #tpu.memory_space<vmem>>, vector<8x128xf32>
    tpu.vector_store %arg6[%c0_14, %c0_15], %24 {strides = array<i32>} : memref<8x128xf32, #tpu.memory_space<vmem>>, vector<8x128xf32>,
    return
  }
  func.func @transform_0(%arg0: i32) -> (i32, i32) {
    %c0_i32 = arith.constant 0 : i32
    %c0_i32_0 = arith.constant 0 : i32
    return %arg0, %c0_i32 : i32, i32
  }
  func.func @transform_1(%arg0: i32) -> (i32, i32) {
    %c0_i32 = arith.constant 0 : i32
    %c0_i32_0 = arith.constant 0 : i32
    %c0_i32_1 = arith.constant 0 : i32
    return %c0_i32, %c0_i32_0 : i32, i32
  }
  func.func @transform_2(%arg0: i32) -> (i32, i32) {
    %c0_i32 = arith.constant 0 : i32
    %c0_i32_0 = arith.constant 0 : i32
    %c0_i32_1 = arith.constant 0 : i32
    return %c0_i32, %c0_i32_0 : i32, i32
  }
  func.func @transform_3(%arg0: i32) -> (i32, i32) {
    %c0_i32 = arith.constant 0 : i32
    %c0_i32_0 = arith.constant 0 : i32
    %c0_i32_1 = arith.constant 0 : i32
    return %c0_i32, %c0_i32_0 : i32, i32
  }
  func.func @transform_4(%arg0: i32) -> (i32, i32) {
    %c0_i32 = arith.constant 0 : i32
    %c0_i32_0 = arith.constant 0 : i32
    %c0_i32_1 = arith.constant 0 : i32
    return %c0_i32, %c0_i32_0 : i32, i32
  }
  func.func @transform_5(%arg0: i32) -> (i32, i32) {
    %c0_i32 = arith.constant 0 : i32
    %c0_i32_0 = arith.constant 0 : i32
    return %arg0, %c0_i32 : i32, i32
  }
}

module attributes {stable_mosaic.version = 11 : i64} {
  func.func @_connector_kernel(%arg0: i32, %arg1: memref<8x128xbf16, #tpu.memory_space<vmem>>, %arg2: memref<128x128xbf16, #tpu.memory_space<vmem>>, %arg3: memref<1x128xf32, #tpu.memory_space<vmem>>, %arg4: memref<128x128xbf16, #tpu.memory_space<vmem>>, %arg5: memref<1x128xf32, #tpu.memory_space<vmem>>, %arg6: memref<8x128xf32, #tpu.memory_space<vmem>>) attributes {dimension_semantics = [#tpu.dimension_semantics<parallel>], iteration_bounds = array<i64: 2>, scalar_prefetch = 0 : i64, scratch_operands = 0 : i64, tpu.core_type = #tpu.core_type<tc>, window_params = [{transform_indices = @transform_0, window_bounds = array<i64: 8, 128>}, {pipeline_mode = #tpu.pipeline_mode<synchronous>, transform_indices = @transform_1, window_bounds = array<i64: 128, 128>}, {pipeline_mode = #tpu.pipeline_mode<synchronous>, transform_indices = @transform_2, window_bounds = array<i64: 1, 128>}, {pipeline_mode = #tpu.pipeline_mode<synchronous>, transform_indices = @transform_3, window_bounds = array<i64: 128, 128>}, {pipeline_mode = #tpu.pipeline_mode<synchronous>, transform_indices = @transform_4, window_bounds = array<i64: 1, 128>}, {transform_indices = @transform_5, window_bounds = array<i64: 8, 128>}]} {
    %c0 = arith.constant 0 : index
    %c0_0 = arith.constant 0 : index
    %0 = vector.load %arg1[%c0, %c0_0] : memref<8x128xbf16, #tpu.memory_space<vmem>>, vector<8x128xbf16>
    %c0_1 = arith.constant 0 : index
    %c0_2 = arith.constant 0 : index
    %1 = vector.load %arg2[%c0_1, %c0_2] : memref<128x128xbf16, #tpu.memory_space<vmem>>, vector<128x128xbf16>
    %cst = arith.constant dense<0.000000e+00> : vector<8x128xf32>
    %2 = tpu.matmul %0, %1, %cst {dimension_numbers = #tpu.dot_dimension_numbers<[1], [0], [0], [1], [0, 0, 1, 1], [], []>} : vector<8x128xbf16>, vector<128x128xbf16>, vector<8x128xf32> -> vector<8x128xf32>
    %c0_3 = arith.constant 0 : index
    %c0_4 = arith.constant 0 : index
    %3 = vector.load %arg3[%c0_3, %c0_4] : memref<1x128xf32, #tpu.memory_space<vmem>>, vector<1x128xf32>
    %4 = vector.broadcast %3 : vector<1x128xf32> to vector<8x128xf32>
    %5 = arith.addf %2, %4 : vector<8x128xf32>
    %cst_5 = arith.constant 5.000000e-01 : f32
    %6 = vector.broadcast %cst_5 : f32 to vector<8x128xf32>
    %7 = arith.mulf %6, %5 : vector<8x128xf32>
    %cst_6 = arith.constant 4.471500e-02 : f32
    %8 = vector.broadcast %cst_6 : f32 to vector<8x128xf32>
    %9 = arith.mulf %8, %5 : vector<8x128xf32>
    %10 = arith.mulf %9, %5 : vector<8x128xf32>
    %11 = arith.mulf %10, %5 : vector<8x128xf32>
    %12 = arith.addf %5, %11 : vector<8x128xf32>
    %cst_7 = arith.constant 0.797884583 : f32
    %13 = vector.broadcast %cst_7 : f32 to vector<8x128xf32>
    %14 = arith.mulf %13, %12 : vector<8x128xf32>
    %15 = math.tanh %14 : vector<8x128xf32>
    %cst_8 = arith.constant 1.000000e+00 : f32
    %16 = vector.broadcast %cst_8 : f32 to vector<8x128xf32>
    %17 = arith.addf %16, %15 : vector<8x128xf32>
    %18 = arith.mulf %7, %17 : vector<8x128xf32>
    %19 = arith.truncf %18 : vector<8x128xf32> to vector<8x128xbf16>
    %c0_9 = arith.constant 0 : index
    %c0_10 = arith.constant 0 : index
    %20 = vector.load %arg4[%c0_9, %c0_10] : memref<128x128xbf16, #tpu.memory_space<vmem>>, vector<128x128xbf16>
    %cst_11 = arith.constant dense<0.000000e+00> : vector<8x128xf32>
    %21 = tpu.matmul %19, %20, %cst_11 {dimension_numbers = #tpu.dot_dimension_numbers<[1], [0], [0], [1], [0, 0, 1, 1], [], []>} : vector<8x128xbf16>, vector<128x128xbf16>, vector<8x128xf32> -> vector<8x128xf32>
    %c0_12 = arith.constant 0 : index
    %c0_13 = arith.constant 0 : index
    %22 = vector.load %arg5[%c0_12, %c0_13] : memref<1x128xf32, #tpu.memory_space<vmem>>, vector<1x128xf32>
    %23 = vector.broadcast %22 : vector<1x128xf32> to vector<8x128xf32>
    %24 = arith.addf %21, %23 : vector<8x128xf32>
    %c0_14 = arith.constant 0 : index
    %c0_15 = arith.constant 0 : index
    %25 = vector.load %arg6[%c0_14, %c0_15] : memref<8x128xf32, #tpu.memory_space<vmem>>, vector<8x128xf32>
    tpu.vector_store %arg6[%c0_14, %c0_15], %24 {strides = array<i32>} : memref<8x128xf32, #tpu.memory_space<vmem>>, vector<8x128xf32>,
    return
  }
  func.func @transform_0(%arg0: i32) -> (i32, i32) {
    %c0_i32 = arith.constant 0 : i32
    %c0_i32_0 = arith.constant 0 : i32
    return %arg0, %c0_i32 : i32, i32
  }
  func.func @transform_1(%arg0: i32) -> (i32, i32) {
    %c0_i32 = arith.constant 0 : i32
    %c0_i32_0 = arith.constant 0 : i32
    %c0_i32_1 = arith.constant 0 : i32
    return %c0_i32, %c0_i32_0 : i32, i32
  }
  func.func @transform_2(%arg0: i32) -> (i32, i32) {
    %c0_i32 = arith.constant 0 : i32
    %c0_i32_0 = arith.constant 0 : i32
    %c0_i32_1 = arith.constant 0 : i32
    return %c0_i32, %c0_i32_0 : i32, i32
  }
  func.func @transform_3(%arg0: i32) -> (i32, i32) {
    %c0_i32 = arith.constant 0 : i32
    %c0_i32_0 = arith.constant 0 : i32
    %c0_i32_1 = arith.constant 0 : i32
    return %c0_i32, %c0_i32_0 : i32, i32
  }
  func.func @transform_4(%arg0: i32) -> (i32, i32) {
    %c0_i32 = arith.constant 0 : i32
    %c0_i32_0 = arith.constant 0 : i32
    %c0_i32_1 = arith.constant 0 : i32
    return %c0_i32, %c0_i32_0 : i32, i32
  }
  func.func @transform_5(%arg0: i32) -> (i32, i32) {
    %c0_i32 = arith.constant 0 : i32
    %c0_i32_0 = arith.constant 0 : i32
    return %arg0, %c0_i32 : i32, i32
  }
}

</mosaic_0001>

<bundles_post_ra>
// kernel: _forward_impl.1
= control target key start
LH: loop header
LB: loop body
LE: loop exit
PB: predicated region body
PF: predicated region fallthrough
CT: control target
= control target key end

     0   :  { %10 = vsyncpa [#allocation3], 0  ;;  %s911_s0 = inlined_call_operand.vmem [shape: bf16[16,128], index: 0, kind: input, shape index: {}]   ;;  %s912_s1 = inlined_call_operand.hbm [shape: bf16[128,128], index: 1, kind: input, shape index: {}]   ;;  %s913_s2 = inlined_call_operand.vmem [shape: f32[1,128], index: 2, kind: input, shape index: {}]   ;;  %s914_s3 = inlined_call_operand.hbm [shape: bf16[128,128], index: 3, kind: input, shape index: {}]   ;;  %s915_s4 = inlined_call_operand.vmem [shape: f32[1,128], index: 4, kind: input, shape index: {}]   ;;  %s916_s5 = inlined_call_operand.vmem [shape: f32[16,128], index: 5, kind: output, shape index: {}]  }
   0x1   :  { %11 = vsyncpa [#allocation5], 0  ;;  %s808_s18 = smov 0  }
   0x2 LB: > { %s814_s19 = sadd.s32 4294967295, %s770_s18   ;;  %p562_p0 = scmp.ge.s32.totalorder %s770_s18, 1  ;;  %s770_s18 = sphi %s808_s18, %s17_s18  }
   0x3   : > { %p158_p1 = scmp.lt.s32.totalorder %s770_s18, 3  ;;  %s772_s20 = smov [#allocation2]  }
   0x4   : > { %s170_s21 = sshll.u32 %s772_s20, 4  ;;  %p917_p3 = scmp.eq.s32.totalorder %s814_s19, 0  ;;  %s171_s21 = int_to_ptr.vmem [resolvable:$true] %s170_s21 }
   0x5   : > { %p818_p2 = pnand %p562_p0, %p158_p1  ;;  %s773_s23 = smov [#allocation4]  }
   0x6   : > { %s186_s24 = sshll.u32 %s773_s23, 4  ;;  %s700_s28 = scalar_lea.hbm %s912_s1, 1024  ;;  %s831_s24 = int_to_ptr.vmem [resolvable:$true] %s186_s24 }
   0x7   : > { %s919_s22 = scalar_select %p818_p2, 1, 0 }
   0x8   : > { %p657_p4 = pneg %p818_p2  ;;  %p701_p6 = scmp.ne.s32.totalorder %s912_s1, %s700_s28 }
   0x9   : > { %p707_p10 = scmp.lt.u32.totalorder %s700_s28, %s912_s1 }
   0xa   : > { %p827_p5 = pnand %p917_p3, %p657_p4 }
   0xc   : > { %p702_p7 = pneg %p827_p5 }
   0xe   : > { %p703_p8 = pnand %p702_p7, %p701_p6 }
  0x10   : > { %p704_p9 = pneg %p703_p8 }
  0x12   : > { %p709_p11 = pnand %p707_p10, %p704_p9 }
  0x14   : > { %712 = shalt.err (!%p709_p11)
}
  0x15   : > { %s713_s8 = scalar_lea.vmem %s171_s21, 1024  ;;  %p721_p1 = scmp.lt.s32.totalorder %s171_s21, %s171_s21 }
  0x16   : > { %p714_p12 = scmp.ne.s32.totalorder %s171_s21, %s713_s8  ;;  %p722_p4 = scmp.lt.s32.totalorder %s713_s8, %s713_s8 }
  0x18   : > { %p716_p13 = pnand %p714_p12, %p702_p7  ;;  %p723_p3 = por %p722_p4, %p721_p1 }
  0x1a   : > { %p717_p0 = pneg %p716_p13 }
  0x1c   : > { %p724_p2 = pnand %p723_p3, %p717_p0 }
  0x1e   : > { %727 = shalt.err (!%p724_p2)
}
  0x1f   : > { %s774_s9 = smov 64   ;;  %s775_s10 = smov 4  }
  0x20   : > { %660 = dma.hbm_to_vmem [thread:$0]  (!%p827_p5), %s912_s1, 1024, %s171_s21, [#allocation3], %s774_s9, %s774_s9, %s775_s10  }
  0x21   : > { %s728_s15 = scalar_lea.hbm %s914_s3, 1024 }
  0x22   : > { %p729_p6 = scmp.ne.s32.totalorder %s914_s3, %s728_s15  ;;  %p735_p8 = scmp.lt.u32.totalorder %s728_s15, %s914_s3 }
  0x24   : > { %p731_p2 = pnand %p729_p6, %p702_p7 }
  0x26   : > { %p732_p3 = pneg %p731_p2 }
  0x28   : > { %p737_p9 = pnand %p735_p8, %p732_p3 }
  0x2a   : > { %740 = shalt.err (!%p737_p9)
}
  0x2b   : > { %s741_s21 = scalar_lea.vmem %s831_s24, 1024  ;;  %p749_p13 = scmp.lt.s32.totalorder %s831_s24, %s831_s24 }
  0x2c   : > { %p742_p10 = scmp.ne.s32.totalorder %s831_s24, %s741_s21  ;;  %p750_p0 = scmp.lt.s32.totalorder %s741_s21, %s741_s21 }
  0x2e   : > { %p744_p11 = pnand %p742_p10, %p702_p7  ;;  %p751_p1 = por %p750_p0, %p749_p13 }
  0x30   : > { %p745_p12 = pneg %p744_p11 }
  0x32   : > { %p752_p4 = pnand %p751_p1, %p745_p12 }
  0x34   : > { %755 = shalt.err (!%p752_p4)
}
  0x35   : > { %663 = dma.hbm_to_vmem [thread:$0]  (!%p827_p5), %s914_s3, 1024, %s831_s24, [#allocation5], %s774_s9, %s774_s9, %s775_s10  }
  0x36   : > { %p921_p6 = scmp.ne.s32.totalorder %s919_s22, 0 }
  0x37   : > { %p922_p2 = scmp.eq.s32.totalorder (!%p921_p6), %s814_s19, 0 }
  0x38   : > { %212 = sbr.rel (%p921_p6) target bundleno = 557 (0x22d), region = 40 }
  0x3f   : > { %761 = dma.done.wait (%p922_p2), [#allocation3], 1024   ;;  %p923_p7 = pmov %p922_p2 }
  0x40   : > { %p924_p3 = pmov %p922_p2 }
  0x41   : > { %763 = vsyncadd (%p923_p7), [#allocation3], 4294966272 }
  0x42   : > { %765 = dma.done.wait (%p924_p3), [#allocation5], 1024   ;;  %p925_p8 = pmov %p922_p2 }
  0x43   : > { %v776_v0 = vmov 0.0   ;;  %vm777_vm0 = vmmov 0   ;;  %v682_v1 = vld [vmem:[#allocation2] sm:$0xff]   ;;  %v683_v2 = vld [vmem:[#allocation2 + $0x8] sm:$0xff]   ;;  %v684_v3 = vld [vmem:[#allocation2 + $0x10] sm:$0xff]   ;;  %p242_p5 = scmp.lt.s32.totalorder %s814_s19, 1 }
  0x44   : > { %767 = vsyncadd (%p925_p8), [#allocation5], 4294966272  ;;  %609 = vmatprep.subr.bf16.mxu0 %v776_v0  ;;  %625 = vmatprep.mubr.msk.bf16.mxu0 %vm777_vm0, %v776_v0  ;;  %v685_v4 = vld [vmem:[#allocation2 + $0x18] sm:$0xff]   ;;  %v690_v5 = vld [vmem:[#allocation4] sm:$0xff]  }
  0x45   : > { %629 = vmatprep.subr.bf16.mxu1 %v776_v0  ;;  %645 = vmatprep.mubr.msk.bf16.mxu1 %vm777_vm0, %v776_v0  ;;  %v686_v6 = vld [vmem:[#allocation2 + $0x20] sm:$0xff]   ;;  %v687_v7 = vld [vmem:[#allocation2 + $0x28] sm:$0xff]   ;;  %s927_s19 = smov (!%p242_p5, %s814_s19), 1  ;;  %v688_v8 = vld [vmem:[#allocation2 + $0x30] sm:$0xff]  }
  0x46   : > { %610 = vmatpush3.bf16.msra.mxu0 %v682_v1  ;;  %630 = vmatpush3.bf16.msra.mxu1 %v690_v5  ;;  %s569_s22 = sshll.u32 %s927_s19, 2  ;;  %v689_v9 = vld [vmem:[#allocation2 + $0x38] sm:$0xff]   ;;  %v691_v11 = vld [vmem:[#allocation4 + $0x8] sm:$0xff]   ;;  %v692_v12 = vld [vmem:[#allocation4 + $0x10] sm:$0xff]   ;;  %s570_s6 = sshll.u32 %s927_s19, 3 }
  0x47   : > { %611 = vmatprep.subr.bf16.mxu0 %v776_v0  ;;  %631 = vmatprep.subr.bf16.mxu1 %v776_v0  ;;  %s245_s28 = scalar_lea.vmem %s911_s0, %s569_s22  ;;  %v693_v13 = vld [vmem:[#allocation4 + $0x18] sm:$0xff]   ;;  %v694_v14 = vld [vmem:[#allocation4 + $0x20] sm:$0xff]   ;;  %v695_v15 = vld [vmem:[#allocation4 + $0x28] sm:$0xff]   ;;  %s249_s11 = scalar_lea.vmem %s916_s5, %s570_s6 }
  0x48   : > { %v251_v10 = vld [vmem:[%s245_s28] sm:$0xf]  ;;  %v696_v16 = vld [vmem:[#allocation4 + $0x30] sm:$0xff]   ;;  %v697_v17 = vld [vmem:[#allocation4 + $0x38] sm:$0xff]  }
  0x49   : > { %v571_v18 = vld [vmem:[%s913_s2] ss:$0 sm:$0xff] }
  0x4a   : > { %612 = vmatpush3.bf16.msra.mxu0 %v683_v2  ;;  %632 = vmatpush3.bf16.msra.mxu1 %v691_v11  ;;  %v580_v34 = vld [vmem:[%s915_s4] ss:$0 sm:$0xff] }
  0x4b   : > { %613 = vmatprep.subr.bf16.mxu0 %v776_v0  ;;  %633 = vmatprep.subr.bf16.mxu1 %v776_v0 }
  0x4e   : > { %614 = vmatpush3.bf16.msra.mxu0 %v684_v3  ;;  %634 = vmatpush3.bf16.msra.mxu1 %v692_v12 }
  0x4f   : > { %615 = vmatprep.subr.bf16.mxu0 %v776_v0  ;;  %635 = vmatprep.subr.bf16.mxu1 %v776_v0 }
  0x52   : > { %616 = vmatpush3.bf16.msra.mxu0 %v685_v4  ;;  %636 = vmatpush3.bf16.msra.mxu1 %v693_v13 }
  0x53   : > { %617 = vmatprep.subr.bf16.mxu0 %v776_v0  ;;  %637 = vmatprep.subr.bf16.mxu1 %v776_v0 }
  0x56   : > { %618 = vmatpush3.bf16.msra.mxu0 %v686_v6  ;;  %638 = vmatpush3.bf16.msra.mxu1 %v694_v14 }
  0x57   : > { %619 = vmatprep.subr.bf16.mxu0 %v776_v0  ;;  %639 = vmatprep.subr.bf16.mxu1 %v776_v0 }
  0x5a   : > { %620 = vmatpush3.bf16.msra.mxu0 %v687_v7  ;;  %640 = vmatpush3.bf16.msra.mxu1 %v695_v15 }
  0x5b   : > { %621 = vmatprep.subr.bf16.mxu0 %v776_v0  ;;  %641 = vmatprep.subr.bf16.mxu1 %v776_v0 }
  0x5e   : > { %622 = vmatpush3.bf16.msra.mxu0 %v688_v8  ;;  %642 = vmatpush3.bf16.msra.mxu1 %v696_v16 }
  0x5f   : > { %623 = vmatprep.subr.bf16.mxu0 %v776_v0  ;;  %643 = vmatprep.subr.bf16.mxu1 %v776_v0 }
  0x62   : > { %624 = vmatpush3.bf16.msra.mxu0 %v689_v9  ;;  %644 = vmatpush3.bf16.msra.mxu1 %v697_v17 }
  0x65   : > { %626 = vmatmul.mubr.bf16.vlgmr.msra.gmra.mrb[0].mxu0 %v251_v10 }
 0x138   : > { %v357_v19 = vpop.f32.mrb[0].mxu0 }
 0x139   : > { %v358_v20 = vadd.f32 %v571_v18, %v357_v19  ;;  %v627_v21 = vpop.f32.mrb[1].mxu0 }
 0x13a   : > { %v360_v22 = vpop.f32.mrb[2].mxu0 }
 0x13b   : > { %v364_v23 = vmul.f32 0.044715, %v358_v20  ;;  %v628_v24 = vpop.f32.mrb[3].mxu0  ;;  %v363_v30 = vmul.f32 0.5, %v358_v20 }
 0x13d   : > { %v365_v25 = vmul.f32 %v364_v23, %v358_v20 }
 0x13f   : > { %v366_v26 = vmul.f32 %v365_v25, %v358_v20 }
 0x141   : > { %v367_v27 = vadd.f32 %v366_v26, %v358_v20 }
 0x143   : > { %v368_v28 = vmul.f32 0.7978846, %v367_v27 }
 0x145   : > { %698 = vtanh.f32 %v368_v28 }
 0x14f   : > { %v699_v29 = vpop.eup %698 }
 0x150   : > { %v370_v31 = vadd.f32 1.0, %v699_v29 }
 0x152   : > { %v371_v32 = vmul.f32 %v370_v31, %v363_v30 }
 0x154   : > { %v372_v33 = vpack.c.bf16 %v371_v32, %v371_v32 }
 0x156   : > { %646 = vmatmul.mubr.bf16.vlgmr.msra.gmra.mrb[0].mxu1 %v372_v33 }
 0x229   : > { %v478_v35 = vpop.f32.mrb[0].mxu1 }
 0x22a   : > { %v479_v36 = vadd.f32 %v580_v34, %v478_v35  ;;  %v647_v37 = vpop.f32.mrb[1].mxu1 }
 0x22b   : > { %v481_v38 = vpop.f32.mrb[2].mxu1 }
 0x22c   : > { %484 = vst [vmem:[%s249_s11] sm:$0xff] %v479_v36  ;;  %v648_v39 = vpop.f32.mrb[3].mxu1 }
 0x22d PF: > { %s17_s18 = sadd.s32 1, %s770_s18  }
 0x22e   : > { %p14_p9 = scmp.ge.s32.totalorder %s17_s18, 4  }
 0x230   :  { %16 = sbr.rel (!%p14_p9) target bundleno = 2 (0x2), region = 79 }
 0x237   :  { %504 = vsyncpa [#allocation3], 1 }
 0x238   :  { %506 = vsyncpa [#allocation3 + $0x1], 1 }
 0x239   :  { %507 = vsyncpa [#allocation5], 1 }

// kernel: _forward_impl.1
= control target key start
LH: loop header
LB: loop body
LE: loop exit
PB: predicated region body
PF: predicated region fallthrough
CT: control target
= control target key end

     0   :  { %10 = vsyncpa [#allocation3], 0  ;;  %s911_s0 = inlined_call_operand.vmem [shape: bf16[16,128], index: 0, kind: input, shape index: {}]   ;;  %s912_s1 = inlined_call_operand.hbm [shape: bf16[128,128], index: 1, kind: input, shape index: {}]   ;;  %s913_s2 = inlined_call_operand.vmem [shape: f32[1,128], index: 2, kind: input, shape index: {}]   ;;  %s914_s3 = inlined_call_operand.hbm [shape: bf16[128,128], index: 3, kind: input, shape index: {}]   ;;  %s915_s4 = inlined_call_operand.vmem [shape: f32[1,128], index: 4, kind: input, shape index: {}]   ;;  %s916_s5 = inlined_call_operand.vmem [shape: f32[16,128], index: 5, kind: output, shape index: {}]  }
   0x1   :  { %11 = vsyncpa [#allocation5], 0  ;;  %s808_s18 = smov 0  }
   0x2 LB: > { %s814_s19 = sadd.s32 4294967295, %s770_s18   ;;  %p562_p0 = scmp.ge.s32.totalorder %s770_s18, 1  ;;  %s770_s18 = sphi %s808_s18, %s17_s18  }
   0x3   : > { %p158_p1 = scmp.lt.s32.totalorder %s770_s18, 3  ;;  %s772_s20 = smov [#allocation2]  }
   0x4   : > { %s170_s21 = sshll.u32 %s772_s20, 4  ;;  %p917_p3 = scmp.eq.s32.totalorder %s814_s19, 0  ;;  %s171_s21 = int_to_ptr.vmem [resolvable:$true] %s170_s21 }
   0x5   : > { %p818_p2 = pnand %p562_p0, %p158_p1  ;;  %s773_s23 = smov [#allocation4]  }
   0x6   : > { %s186_s24 = sshll.u32 %s773_s23, 4  ;;  %s700_s28 = scalar_lea.hbm %s912_s1, 1024  ;;  %s831_s24 = int_to_ptr.vmem [resolvable:$true] %s186_s24 }
   0x7   : > { %s919_s22 = scalar_select %p818_p2, 1, 0 }
   0x8   : > { %p657_p4 = pneg %p818_p2  ;;  %p701_p6 = scmp.ne.s32.totalorder %s912_s1, %s700_s28 }
   0x9   : > { %p707_p10 = scmp.lt.u32.totalorder %s700_s28, %s912_s1 }
   0xa   : > { %p827_p5 = pnand %p917_p3, %p657_p4 }
   0xc   : > { %p702_p7 = pneg %p827_p5 }
   0xe   : > { %p703_p8 = pnand %p702_p7, %p701_p6 }
  0x10   : > { %p704_p9 = pneg %p703_p8 }
  0x12   : > { %p709_p11 = pnand %p707_p10, %p704_p9 }
  0x14   : > { %712 = shalt.err (!%p709_p11)
}
  0x15   : > { %s713_s8 = scalar_lea.vmem %s171_s21, 1024  ;;  %p721_p1 = scmp.lt.s32.totalorder %s171_s21, %s171_s21 }
  0x16   : > { %p714_p12 = scmp.ne.s32.totalorder %s171_s21, %s713_s8  ;;  %p722_p4 = scmp.lt.s32.totalorder %s713_s8, %s713_s8 }
  0x18   : > { %p716_p13 = pnand %p714_p12, %p702_p7  ;;  %p723_p3 = por %p722_p4, %p721_p1 }
  0x1a   : > { %p717_p0 = pneg %p716_p13 }
  0x1c   : > { %p724_p2 = pnand %p723_p3, %p717_p0 }
  0x1e   : > { %727 = shalt.err (!%p724_p2)
}
  0x1f   : > { %s774_s9 = smov 64   ;;  %s775_s10 = smov 4  }
  0x20   : > { %660 = dma.hbm_to_vmem [thread:$0]  (!%p827_p5), %s912_s1, 1024, %s171_s21, [#allocation3], %s774_s9, %s774_s9, %s775_s10  }
  0x21   : > { %s728_s15 = scalar_lea.hbm %s914_s3, 1024 }
  0x22   : > { %p729_p6 = scmp.ne.s32.totalorder %s914_s3, %s728_s15  ;;  %p735_p8 = scmp.lt.u32.totalorder %s728_s15, %s914_s3 }
  0x24   : > { %p731_p2 = pnand %p729_p6, %p702_p7 }
  0x26   : > { %p732_p3 = pneg %p731_p2 }
  0x28   : > { %p737_p9 = pnand %p735_p8, %p732_p3 }
  0x2a   : > { %740 = shalt.err (!%p737_p9)
}
  0x2b   : > { %s741_s21 = scalar_lea.vmem %s831_s24, 1024  ;;  %p749_p13 = scmp.lt.s32.totalorder %s831_s24, %s831_s24 }
  0x2c   : > { %p742_p10 = scmp.ne.s32.totalorder %s831_s24, %s741_s21  ;;  %p750_p0 = scmp.lt.s32.totalorder %s741_s21, %s741_s21 }
  0x2e   : > { %p744_p11 = pnand %p742_p10, %p702_p7  ;;  %p751_p1 = por %p750_p0, %p749_p13 }
  0x30   : > { %p745_p12 = pneg %p744_p11 }
  0x32   : > { %p752_p4 = pnand %p751_p1, %p745_p12 }
  0x34   : > { %755 = shalt.err (!%p752_p4)
}
  0x35   : > { %663 = dma.hbm_to_vmem [thread:$0]  (!%p827_p5), %s914_s3, 1024, %s831_s24, [#allocation5], %s774_s9, %s774_s9, %s775_s10  }
  0x36   : > { %p921_p6 = scmp.ne.s32.totalorder %s919_s22, 0 }
  0x37   : > { %p922_p2 = scmp.eq.s32.totalorder (!%p921_p6), %s814_s19, 0 }
  0x38   : > { %212 = sbr.rel (%p921_p6) target bundleno = 557 (0x22d), region = 40 }
  0x3f   : > { %761 = dma.done.wait (%p922_p2), [#allocation3], 1024   ;;  %p923_p7 = pmov %p922_p2 }
  0x40   : > { %p924_p3 = pmov %p922_p2 }
  0x41   : > { %763 = vsyncadd (%p923_p7), [#allocation3], 4294966272 }
  0x42   : > { %765 = dma.done.wait (%p924_p3), [#allocation5], 1024   ;;  %p925_p8 = pmov %p922_p2 }
  0x43   : > { %v776_v0 = vmov 0.0   ;;  %vm777_vm0 = vmmov 0   ;;  %v682_v1 = vld [vmem:[#allocation2] sm:$0xff]   ;;  %v683_v2 = vld [vmem:[#allocation2 + $0x8] sm:$0xff]   ;;  %v684_v3 = vld [vmem:[#allocation2 + $0x10] sm:$0xff]   ;;  %p242_p5 = scmp.lt.s32.totalorder %s814_s19, 1 }
  0x44   : > { %767 = vsyncadd (%p925_p8), [#allocation5], 4294966272  ;;  %609 = vmatprep.subr.bf16.mxu0 %v776_v0  ;;  %625 = vmatprep.mubr.msk.bf16.mxu0 %vm777_vm0, %v776_v0  ;;  %v685_v4 = vld [vmem:[#allocation2 + $0x18] sm:$0xff]   ;;  %v690_v5 = vld [vmem:[#allocation4] sm:$0xff]  }
  0x45   : > { %629 = vmatprep.subr.bf16.mxu1 %v776_v0  ;;  %645 = vmatprep.mubr.msk.bf16.mxu1 %vm777_vm0, %v776_v0  ;;  %v686_v6 = vld [vmem:[#allocation2 + $0x20] sm:$0xff]   ;;  %v687_v7 = vld [vmem:[#allocation2 + $0x28] sm:$0xff]   ;;  %s927_s19 = smov (!%p242_p5, %s814_s19), 1  ;;  %v688_v8 = vld [vmem:[#allocation2 + $0x30] sm:$0xff]  }
  0x46   : > { %610 = vmatpush3.bf16.msra.mxu0 %v682_v1  ;;  %630 = vmatpush3.bf16.msra.mxu1 %v690_v5  ;;  %s569_s22 = sshll.u32 %s927_s19, 2  ;;  %v689_v9 = vld [vmem:[#allocation2 + $0x38] sm:$0xff]   ;;  %v691_v11 = vld [vmem:[#allocation4 + $0x8] sm:$0xff]   ;;  %v692_v12 = vld [vmem:[#allocation4 + $0x10] sm:$0xff]   ;;  %s570_s6 = sshll.u32 %s927_s19, 3 }
  0x47   : > { %611 = vmatprep.subr.bf16.mxu0 %v776_v0  ;;  %631 = vmatprep.subr.bf16.mxu1 %v776_v0  ;;  %s245_s28 = scalar_lea.vmem %s911_s0, %s569_s22  ;;  %v693_v13 = vld [vmem:[#allocation4 + $0x18] sm:$0xff]   ;;  %v694_v14 = vld [vmem:[#allocation4 + $0x20] sm:$0xff]   ;;  %v695_v15 = vld [vmem:[#allocation4 + $0x28] sm:$0xff]   ;;  %s249_s11 = scalar_lea.vmem %s916_s5, %s570_s6 }
  0x48   : > { %v251_v10 = vld [vmem:[%s245_s28] sm:$0xf]  ;;  %v696_v16 = vld [vmem:[#allocation4 + $0x30] sm:$0xff]   ;;  %v697_v17 = vld [vmem:[#allocation4 + $0x38] sm:$0xff]  }
  0x49   : > { %v571_v18 = vld [vmem:[%s913_s2] ss:$0 sm:$0xff] }
  0x4a   : > { %612 = vmatpush3.bf16.msra.mxu0 %v683_v2  ;;  %632 = vmatpush3.bf16.msra.mxu1 %v691_v11  ;;  %v580_v34 = vld [vmem:[%s915_s4] ss:$0 sm:$0xff] }
  0x4b   : > { %613 = vmatprep.subr.bf16.mxu0 %v776_v0  ;;  %633 = vmatprep.subr.bf16.mxu1 %v776_v0 }
  0x4e   : > { %614 = vmatpush3.bf16.msra.mxu0 %v684_v3  ;;  %634 = vmatpush3.bf16.msra.mxu1 %v692_v12 }
  0x4f   : > { %615 = vmatprep.subr.bf16.mxu0 %v776_v0  ;;  %635 = vmatprep.subr.bf16.mxu1 %v776_v0 }
  0x52   : > { %616 = vmatpush3.bf16.msra.mxu0 %v685_v4  ;;  %636 = vmatpush3.bf16.msra.mxu1 %v693_v13 }
  0x53   : > { %617 = vmatprep.subr.bf16.mxu0 %v776_v0  ;;  %637 = vmatprep.subr.bf16.mxu1 %v776_v0 }
  0x56   : > { %618 = vmatpush3.bf16.msra.mxu0 %v686_v6  ;;  %638 = vmatpush3.bf16.msra.mxu1 %v694_v14 }
  0x57   : > { %619 = vmatprep.subr.bf16.mxu0 %v776_v0  ;;  %639 = vmatprep.subr.bf16.mxu1 %v776_v0 }
  0x5a   : > { %620 = vmatpush3.bf16.msra.mxu0 %v687_v7  ;;  %640 = vmatpush3.bf16.msra.mxu1 %v695_v15 }
  0x5b   : > { %621 = vmatprep.subr.bf16.mxu0 %v776_v0  ;;  %641 = vmatprep.subr.bf16.mxu1 %v776_v0 }
  0x5e   : > { %622 = vmatpush3.bf16.msra.mxu0 %v688_v8  ;;  %642 = vmatpush3.bf16.msra.mxu1 %v696_v16 }
  0x5f   : > { %623 = vmatprep.subr.bf16.mxu0 %v776_v0  ;;  %643 = vmatprep.subr.bf16.mxu1 %v776_v0 }
  0x62   : > { %624 = vmatpush3.bf16.msra.mxu0 %v689_v9  ;;  %644 = vmatpush3.bf16.msra.mxu1 %v697_v17 }
  0x65   : > { %626 = vmatmul.mubr.bf16.vlgmr.msra.gmra.mrb[0].mxu0 %v251_v10 }
 0x138   : > { %v357_v19 = vpop.f32.mrb[0].mxu0 }
 0x139   : > { %v358_v20 = vadd.f32 %v571_v18, %v357_v19  ;;  %v627_v21 = vpop.f32.mrb[1].mxu0 }
 0x13a   : > { %v360_v22 = vpop.f32.mrb[2].mxu0 }
 0x13b   : > { %v364_v23 = vmul.f32 0.044715, %v358_v20  ;;  %v628_v24 = vpop.f32.mrb[3].mxu0  ;;  %v363_v30 = vmul.f32 0.5, %v358_v20 }
 0x13d   : > { %v365_v25 = vmul.f32 %v364_v23, %v358_v20 }
 0x13f   : > { %v366_v26 = vmul.f32 %v365_v25, %v358_v20 }
 0x141   : > { %v367_v27 = vadd.f32 %v366_v26, %v358_v20 }
 0x143   : > { %v368_v28 = vmul.f32 0.7978846, %v367_v27 }
 0x145   : > { %698 = vtanh.f32 %v368_v28 }
 0x14f   : > { %v699_v29 = vpop.eup %698 }
 0x150   : > { %v370_v31 = vadd.f32 1.0, %v699_v29 }
 0x152   : > { %v371_v32 = vmul.f32 %v370_v31, %v363_v30 }
 0x154   : > { %v372_v33 = vpack.c.bf16 %v371_v32, %v371_v32 }
 0x156   : > { %646 = vmatmul.mubr.bf16.vlgmr.msra.gmra.mrb[0].mxu1 %v372_v33 }
 0x229   : > { %v478_v35 = vpop.f32.mrb[0].mxu1 }
 0x22a   : > { %v479_v36 = vadd.f32 %v580_v34, %v478_v35  ;;  %v647_v37 = vpop.f32.mrb[1].mxu1 }
 0x22b   : > { %v481_v38 = vpop.f32.mrb[2].mxu1 }
 0x22c   : > { %484 = vst [vmem:[%s249_s11] sm:$0xff] %v479_v36  ;;  %v648_v39 = vpop.f32.mrb[3].mxu1 }
 0x22d PF: > { %s17_s18 = sadd.s32 1, %s770_s18  }
 0x22e   : > { %p14_p9 = scmp.ge.s32.totalorder %s17_s18, 4  }
 0x230   :  { %16 = sbr.rel (!%p14_p9) target bundleno = 2 (0x2), region = 79 }
 0x237   :  { %504 = vsyncpa [#allocation3], 1 }
 0x238   :  { %506 = vsyncpa [#allocation3 + $0x1], 1 }
 0x239   :  { %507 = vsyncpa [#allocation5], 1 }

</bundles_post_ra>
